<compile_context>
chip_gen: v5e
topology: v5e:2x2
jax: 0.10.0
libtpu: 0.0.40
codegen_flags: <defaults>
</compile_context>

<pallas_src>
import functools

import jax
import jax.numpy as jnp
from jax.experimental import pallas as pl
from jax.experimental.pallas import tpu as pltpu


def _round_up(a, m):
    return (a + m - 1) // m * m


# ----------------------------------------------------------------------------
# Pallas kernel: one (batch, spatial-tile) block per grid step.
# Channel-major layout: (channels, pixels), pixels on the TPU lane axis.
# ----------------------------------------------------------------------------
def _nca_kernel(x_ref, m_ref, wf_ref, wh_ref, wn_ref, extra_ref,
                out_ref, noise_ref, tap_ref,
                *, W, PAD, TN, KPAD, S, C, CN):
    # Window of the resident image plane covering this tile plus a PAD-lane
    # halo on each side (PAD >= W+1, so every 3x3 neighbour is inside it).
    if S == 1:
        start = 0                                           # fully static path
    else:
        start = pl.multiple_of(pl.program_id(1) * TN, 128)  # aligned dynamic slice
    win = TN + 2 * PAD

    xw = x_ref[0, :, pl.ds(start, win)]                     # (C, win)  bf16
    mw = m_ref[:, pl.ds(start, win)]                        # (2, win)  bf16
    # Source-side column masks: a pixel in image-column W-1 may never act as a
    # "left neighbour", and a pixel in column 0 never as a "right neighbour".
    xw_l = xw * mw[0:1, :]                                  # sources for dw = -1 taps
    xw_r = xw * mw[1:2, :]                                  # sources for dw = +1 taps

    # Stack the 9 shifted taps (static lane-offset slices of the window) into
    # the MXU operand held in VMEM scratch.  Vertical borders need no mask:
    # the plane is zero padded above/below the image.
    k = 0
    for dh in (-1, 0, 1):
        o = PAD + dh * W
        tap_ref[k * C:(k + 1) * C, :] = xw_l[:, o - 1:o - 1 + TN]; k += 1   # dw = -1
        tap_ref[k * C:(k + 1) * C, :] = xw[:, o:o + TN];           k += 1   # dw =  0
        tap_ref[k * C:(k + 1) * C, :] = xw_r[:, o + 1:o + 1 + TN]; k += 1   # dw = +1
    # Row 9C = ones (folds the perceive + conv1 biases); rows above = zeros so
    # the padded K columns never multiply uninitialised VMEM garbage.
    tap_ref[9 * C:, :] = jnp.zeros((KPAD - 9 * C, TN), dtype=tap_ref.dtype)
    tap_ref[9 * C:9 * C + 1, :] = jnp.ones((1, TN), dtype=tap_ref.dtype)

    # perceive (3x3 depthwise + bias) folded with rule conv1 -> one MXU matmul
    h = jnp.dot(wf_ref[...], tap_ref[...],
                preferred_element_type=jnp.float32)          # (HID, TN) f32
    hb = jnp.maximum(h, 0.0).astype(jnp.bfloat16)            # single in-kernel cast

    # Fused heads: rows [:C] = conv2 (dx), rows [C:] = conv2 @ noise_conv.
    head = jnp.dot(wh_ref[...], hb,
                   preferred_element_type=jnp.float32)       # (C+CN, TN) f32

    xc = xw[:, PAD:PAD + TN].astype(jnp.float32)             # residual base = center tap
    x2 = xc + head[:C, :]

    # noise = wn^T x2 + bn = wn^T xc + (w2 wn)^T h + bn ;  wn^T xc on the VPU
    # (3x6 per pixel -> not worth an MXU result pop).
    wnv = wn_ref[...]                                        # (CN, C) f32
    nx = jnp.zeros((CN, TN), jnp.float32)
    for c in range(C):
        nx = nx + wnv[:, c:c + 1] * xc[c:c + 1, :]

    extra = extra_ref[0]                                     # (C+CN, 1): [time emb ; bn]
    out_ref[0] = (x2 + extra[:C, :]).astype(out_ref.dtype)
    noise_ref[0] = (nx + head[C:, :] + extra[C:, :]).astype(noise_ref.dtype)


# ----------------------------------------------------------------------------
# Glue (plain JAX): sinusoidal time encoding, tiny time-embedding linear,
# tap->dense weight folding, mask construction, pallas_call.
# ----------------------------------------------------------------------------
def pos_encoding(t, channels):
    t = t.reshape(-1, 1).astype(jnp.float32)
    inv_freq = 1.0 / (10000.0 ** (jnp.arange(0, channels, 2, dtype=jnp.float32)
                                  / channels))
    ang = t * inv_freq
    return jnp.concatenate([jnp.sin(ang), jnp.cos(ang)], axis=-1)


def build_tap_weights(w_dw, c_in, perception_size):
    """w_dw: (P, 3, 3) depthwise weight -> (9, C, P) dense per-tap matrices."""
    m = perception_size // c_in
    c_of_p = jnp.arange(perception_size) // m
    onehot = jax.nn.one_hot(c_of_p, c_in, dtype=jnp.float32).T      # (C, P)
    w_flat = w_dw.reshape(perception_size, 9).T                     # (9, P), k = kh*3+kw
    return onehot[None, :, :] * w_flat[:, None, :]                  # (9, C, P)


def nca_diff_forward(x_nchw, t, params, *, max_tile=4096):
    B, C, H, W = x_nchw.shape
    P, HID = params["w1"].shape
    CN = params["wn"].shape[-1]
    C9 = 9 * C
    KPAD = _round_up(C9 + 1, 16)                 # taps + bias row, padded K
    N = H * W

    # ---- spatial tiling: largest tile (cap max_tile) with <=12.5% pad waste.
    n128 = _round_up(N, 128)
    TN = 128
    for cand in (8192, 4096, 2048, 1024, 512, 256, 128):
        if cand <= max_tile and _round_up(N, cand) <= (n128 * 9) // 8:
            TN = cand
            break
    Np = _round_up(N, TN)
    S = Np // TN
    PAD = _round_up(W + 1, 128)                  # halo >= one image row + 1 pixel
    Lp = PAD + Np + PAD

    # ---- fold perceive taps (+biases) and conv1 into one (HID, KPAD) weight (f32 fold)
    w_perc = params["taps"].reshape(C9, P)                        # (9C, P)
    w_fold = w_perc @ params["w1"]                                # (9C, HID)
    b_fold = params["bperc"] @ params["w1"] + params["b1"]        # (HID,)
    wf = jnp.zeros((KPAD, HID), jnp.float32)
    wf = wf.at[:C9].set(w_fold).at[C9].set(b_fold)
    wf = wf.T.astype(jnp.bfloat16)                                # (HID, KPAD)

    # ---- fuse conv2 and the noise head into one (C+CN, HID) weight
    w2, wn = params["w2"], params["wn"]                           # (HID,C), (C,CN)
    w_head = jnp.concatenate([w2.T, (w2 @ wn).T], axis=0).astype(jnp.bfloat16)
    wn_t = wn.T.astype(jnp.float32)                               # (CN, C)

    # ---- per-batch additive vector: [time embedding ; noise bias]
    pe = pos_encoding(t, params["time_dim"])
    emb = jax.nn.silu(pe) @ params["wt"] + params["bt"]           # (B, C)
    extra = jnp.concatenate(
        [emb, jnp.broadcast_to(params["bn"][None, :], (B, CN))], axis=1)
    extra = extra[:, :, None].astype(jnp.float32)                 # (B, C+CN, 1)

    # ---- image plane: bf16, flattened, zero halo of PAD lanes on both sides
    x_flat = x_nchw.astype(jnp.float32).reshape(B, C, N).astype(jnp.bfloat16)
    x_pad = jnp.pad(x_flat, ((0, 0), (0, 0), (PAD, PAD + Np - N)))

    # ---- per-column source masks for the horizontal taps
    col = jnp.arange(N, dtype=jnp.int32) % W
    masks = jnp.stack([(col != W - 1), (col != 0)], axis=0).astype(jnp.bfloat16)
    masks = jnp.pad(masks, ((0, 0), (PAD, PAD + Np - N)))         # (2, Lp)

    kernel = functools.partial(_nca_kernel, W=W, PAD=PAD, TN=TN, KPAD=KPAD,
                               S=S, C=C, CN=CN)
    out, noise = pl.pallas_call(
        kernel,
        out_shape=(jax.ShapeDtypeStruct((B, C, Np), jnp.float32),
                   jax.ShapeDtypeStruct((B, CN, Np), jnp.float32)),
        grid=(B, S),
        in_specs=[
            pl.BlockSpec((1, C, Lp), lambda b, s: (b, 0, 0)),      # resident image plane
            pl.BlockSpec((2, Lp), lambda b, s: (0, 0)),            # column masks
            pl.BlockSpec((HID, KPAD), lambda b, s: (0, 0)),        # folded perceive+conv1 (+bias col)
            pl.BlockSpec((C + CN, HID), lambda b, s: (0, 0)),      # fused conv2 / noise head
            pl.BlockSpec((CN, C), lambda b, s: (0, 0)),            # wn^T for the VPU term
            pl.BlockSpec((1, C + CN, 1), lambda b, s: (b, 0, 0)),  # [time emb ; bn]
        ],
        out_specs=(
            pl.BlockSpec((1, C, TN), lambda b, s: (b, 0, s)),
            pl.BlockSpec((1, CN, TN), lambda b, s: (b, 0, s)),
        ),
        scratch_shapes=[pltpu.VMEM((KPAD, TN), jnp.bfloat16)],     # stacked tap operand
        compiler_params=pltpu.CompilerParams(
            dimension_semantics=("parallel", "parallel")),
    )(x_pad, masks, wf, w_head, wn_t, extra)

    # channel-major already -> drop spatial padding and unflatten
    out = out[:, :, :N].reshape(B, C, H, W)
    noise = noise[:, :, :N].reshape(B, CN, H, W)
    return out, noise


# ----------------------------------------------------------------------------
# Pure-JAX reference (correctness check against the Pallas kernel).
# ----------------------------------------------------------------------------
def reference_forward(x_nchw, t, params):
    B, C, H, W = x_nchw.shape
    y = jax.lax.conv_general_dilated(
        x_nchw, params["w_dw"][:, None, :, :], window_strides=(1, 1),
        padding="SAME", feature_group_count=C,
        dimension_numbers=("NCHW", "OIHW", "NCHW"))
    y = y + params["bperc"][None, :, None, None]
    h = jax.nn.relu(jnp.einsum("bphw,pk->bkhw", y, params["w1"])
                    + params["b1"][None, :, None, None])
    dx = jnp.einsum("bkhw,kc->bchw", h, params["w2"])
    x2 = x_nchw + dx
    noise = jnp.einsum("bchw,cn->bnhw", x2, params["wn"]) \
        + params["bn"][None, :, None, None]
    pe = pos_encoding(t, params["time_dim"])
    emb = jax.nn.silu(pe) @ params["wt"] + params["bt"]
    out = x2 + emb[:, :, None, None]
    return out, noise


if __name__ == "__main__":
    # Module defaults where feasible (small shapes):
    #   c_in % c_noise == 0, perception_size % c_in == 0, time_dim even.
    B, C_IN, H, W = 2, 6, 16, 16
    C_NOISE, HIDDEN, PERC, TIME_DIM = 3, 128, 48, 256

    key = jax.random.PRNGKey(0)
    ks = jax.random.split(key, 11)
    s = 0.1
    w_dw = jax.random.normal(ks[0], (PERC, 3, 3), jnp.float32) * s  # (P,1,3,3) squeezed
    bperc = jax.random.normal(ks[1], (PERC,), jnp.float32) * s
    w1 = jax.random.normal(ks[2], (PERC, HIDDEN), jnp.float32) * s
    b1 = jax.random.normal(ks[3], (HIDDEN,), jnp.float32) * s
    # NOTE: PyTorch zero-inits conv2.weight; random here so the path is exercised.
    w2 = jax.random.normal(ks[4], (HIDDEN, C_IN), jnp.float32) * s
    wn = jax.random.normal(ks[5], (C_IN, C_NOISE), jnp.float32) * s
    bn = jax.random.normal(ks[6], (C_NOISE,), jnp.float32) * s
    wt = jax.random.normal(ks[7], (TIME_DIM, C_IN), jnp.float32) * s
    bt = jax.random.normal(ks[8], (C_IN,), jnp.float32) * s

    params = dict(
        w_dw=w_dw,
        taps=build_tap_weights(w_dw, C_IN, PERC),
        bperc=bperc, w1=w1, b1=b1, w2=w2, wn=wn, bn=bn,
        wt=wt, bt=bt, time_dim=TIME_DIM,
    )

    x = jax.random.normal(ks[9], (B, C_IN, H, W), jnp.float32)
    t = jnp.array([7.0, 42.0], jnp.float32)

    out, noise = nca_diff_forward(x, t, params)
    out = jax.block_until_ready(out)
    noise = jax.block_until_ready(noise)

    out_ref, noise_ref = reference_forward(x, t, params)
    assert out.shape == (B, C_IN, H, W) and noise.shape == (B, C_NOISE, H, W)
    # bf16 image plane + bf16 matmul operands -> looser tolerance than pure f32
    assert jnp.allclose(out, out_ref, atol=2e-2, rtol=2e-2)
    assert jnp.allclose(noise, noise_ref, atol=2e-2, rtol=2e-2)

    print("KERNEL_OK")
</pallas_src>

<mosaic_0001>
module attributes {stable_mosaic.version = 11 : i64} {
  func.func @_nca_kernel(%arg0: i32, %arg1: i32, %arg2: memref<1x6x512xbf16, #tpu.memory_space<vmem>>, %arg3: memref<2x512xbf16, #tpu.memory_space<vmem>>, %arg4: memref<128x64xbf16, #tpu.memory_space<vmem>>, %arg5: memref<9x128xbf16, #tpu.memory_space<vmem>>, %arg6: memref<3x6xf32, #tpu.memory_space<vmem>>, %arg7: memref<1x9x1xf32, #tpu.memory_space<vmem>>, %arg8: memref<1x6x256xf32, #tpu.memory_space<vmem>>, %arg9: memref<1x3x256xf32, #tpu.memory_space<vmem>>, %arg10: memref<64x256xbf16, #tpu.memory_space<vmem>>) attributes {dimension_semantics = [#tpu.dimension_semantics<parallel>, #tpu.dimension_semantics<parallel>], iteration_bounds = array<i64: 2, 1>, scalar_prefetch = 0 : i64, scratch_operands = 1 : i64, tpu.core_type = #tpu.core_type<tc>, window_params = [{transform_indices = @transform_0, window_bounds = array<i64: 1, 6, 512>}, {pipeline_mode = #tpu.pipeline_mode<synchronous>, transform_indices = @transform_1, window_bounds = array<i64: 2, 512>}, {pipeline_mode = #tpu.pipeline_mode<synchronous>, transform_indices = @transform_2, window_bounds = array<i64: 128, 64>}, {pipeline_mode = #tpu.pipeline_mode<synchronous>, transform_indices = @transform_3, window_bounds = array<i64: 9, 128>}, {pipeline_mode = #tpu.pipeline_mode<synchronous>, transform_indices = @transform_4, window_bounds = array<i64: 3, 6>}, {transform_indices = @transform_5, window_bounds = array<i64: 1, 9, 1>}, {transform_indices = @transform_6, window_bounds = array<i64: 1, 6, 256>}, {transform_indices = @transform_7, window_bounds = array<i64: 1, 3, 256>}]} {
    %c0 = arith.constant 0 : index
    %c0_0 = arith.constant 0 : index
    %c0_1 = arith.constant 0 : index
    %0 = vector.load %arg2[%c0, %c0_0, %c0_1] : memref<1x6x512xbf16, #tpu.memory_space<vmem>>, vector<1x6x512xbf16>
    %1 = vector.shape_cast %0 : vector<1x6x512xbf16> to vector<6x512xbf16>
    %c0_2 = arith.constant 0 : index
    %c0_3 = arith.constant 0 : index
    %2 = vector.load %arg3[%c0_2, %c0_3] : memref<2x512xbf16, #tpu.memory_space<vmem>>, vector<2x512xbf16>
    %3 = vector.extract_strided_slice %2 {offsets = [0, 0], sizes = [1, 512], strides = [1, 1]} : vector<2x512xbf16> to vector<1x512xbf16>
    %4 = vector.broadcast %3 : vector<1x512xbf16> to vector<6x512xbf16>
    %5 = arith.mulf %1, %4 : vector<6x512xbf16>
    %6 = vector.extract_strided_slice %2 {offsets = [1, 0], sizes = [1, 512], strides = [1, 1]} : vector<2x512xbf16> to vector<1x512xbf16>
    %7 = vector.broadcast %6 : vector<1x512xbf16> to vector<6x512xbf16>
    %8 = arith.mulf %1, %7 : vector<6x512xbf16>
    %9 = vector.extract_strided_slice %5 {offsets = [0, 111], sizes = [6, 256], strides = [1, 1]} : vector<6x512xbf16> to vector<6x256xbf16>
    %c0_4 = arith.constant 0 : index
    %c0_5 = arith.constant 0 : index
    %10 = vector.load %arg10[%c0_4, %c0_5] : memref<64x256xbf16, #tpu.memory_space<vmem>>, vector<6x256xbf16>
    tpu.vector_store %arg10[%c0_4, %c0_5], %9 {strides = array<i32>} : memref<64x256xbf16, #tpu.memory_space<vmem>>, vector<6x256xbf16>,
    %11 = vector.extract_strided_slice %1 {offsets = [0, 112], sizes = [6, 256], strides = [1, 1]} : vector<6x512xbf16> to vector<6x256xbf16>
    %c6 = arith.constant 6 : index
    %c0_6 = arith.constant 0 : index
    %12 = vector.load %arg10[%c6, %c0_6] : memref<64x256xbf16, #tpu.memory_space<vmem>>, vector<6x256xbf16>
    tpu.vector_store %arg10[%c6, %c0_6], %11 {strides = array<i32>} : memref<64x256xbf16, #tpu.memory_space<vmem>>, vector<6x256xbf16>,
    %13 = vector.extract_strided_slice %8 {offsets = [0, 113], sizes = [6, 256], strides = [1, 1]} : vector<6x512xbf16> to vector<6x256xbf16>
    %c12 = arith.constant 12 : index
    %c0_7 = arith.constant 0 : index
    %14 = vector.load %arg10[%c12, %c0_7] : memref<64x256xbf16, #tpu.memory_space<vmem>>, vector<6x256xbf16>
    tpu.vector_store %arg10[%c12, %c0_7], %13 {strides = array<i32>} : memref<64x256xbf16, #tpu.memory_space<vmem>>, vector<6x256xbf16>,
    %15 = vector.extract_strided_slice %5 {offsets = [0, 127], sizes = [6, 256], strides = [1, 1]} : vector<6x512xbf16> to vector<6x256xbf16>
    %c18 = arith.constant 18 : index
    %c0_8 = arith.constant 0 : index
    %16 = vector.load %arg10[%c18, %c0_8] : memref<64x256xbf16, #tpu.memory_space<vmem>>, vector<6x256xbf16>
    tpu.vector_store %arg10[%c18, %c0_8], %15 {strides = array<i32>} : memref<64x256xbf16, #tpu.memory_space<vmem>>, vector<6x256xbf16>,
    %17 = vector.extract_strided_slice %1 {offsets = [0, 128], sizes = [6, 256], strides = [1, 1]} : vector<6x512xbf16> to vector<6x256xbf16>
    %c24 = arith.constant 24 : index
    %c0_9 = arith.constant 0 : index
    %18 = vector.load %arg10[%c24, %c0_9] : memref<64x256xbf16, #tpu.memory_space<vmem>>, vector<6x256xbf16>
    tpu.vector_store %arg10[%c24, %c0_9], %17 {strides = array<i32>} : memref<64x256xbf16, #tpu.memory_space<vmem>>, vector<6x256xbf16>,
    %19 = vector.extract_strided_slice %8 {offsets = [0, 129], sizes = [6, 256], strides = [1, 1]} : vector<6x512xbf16> to vector<6x256xbf16>
    %c30 = arith.constant 30 : index
    %c0_10 = arith.constant 0 : index
    %20 = vector.load %arg10[%c30, %c0_10] : memref<64x256xbf16, #tpu.memory_space<vmem>>, vector<6x256xbf16>
    tpu.vector_store %arg10[%c30, %c0_10], %19 {strides = array<i32>} : memref<64x256xbf16, #tpu.memory_space<vmem>>, vector<6x256xbf16>,
    %21 = vector.extract_strided_slice %5 {offsets = [0, 143], sizes = [6, 256], strides = [1, 1]} : vector<6x512xbf16> to vector<6x256xbf16>
    %c36 = arith.constant 36 : index
    %c0_11 = arith.constant 0 : index
    %22 = vector.load %arg10[%c36, %c0_11] : memref<64x256xbf16, #tpu.memory_space<vmem>>, vector<6x256xbf16>
    tpu.vector_store %arg10[%c36, %c0_11], %21 {strides = array<i32>} : memref<64x256xbf16, #tpu.memory_space<vmem>>, vector<6x256xbf16>,
    %23 = vector.extract_strided_slice %1 {offsets = [0, 144], sizes = [6, 256], strides = [1, 1]} : vector<6x512xbf16> to vector<6x256xbf16>
    %c42 = arith.constant 42 : index
    %c0_12 = arith.constant 0 : index
    %24 = vector.load %arg10[%c42, %c0_12] : memref<64x256xbf16, #tpu.memory_space<vmem>>, vector<6x256xbf16>
    tpu.vector_store %arg10[%c42, %c0_12], %23 {strides = array<i32>} : memref<64x256xbf16, #tpu.memory_space<vmem>>, vector<6x256xbf16>,
    %25 = vector.extract_strided_slice %8 {offsets = [0, 145], sizes = [6, 256], strides = [1, 1]} : vector<6x512xbf16> to vector<6x256xbf16>
    %c48 = arith.constant 48 : index
    %c0_13 = arith.constant 0 : index
    %26 = vector.load %arg10[%c48, %c0_13] : memref<64x256xbf16, #tpu.memory_space<vmem>>, vector<6x256xbf16>
    tpu.vector_store %arg10[%c48, %c0_13], %25 {strides = array<i32>} : memref<64x256xbf16, #tpu.memory_space<vmem>>, vector<6x256xbf16>,
    %cst = arith.constant 0.000000e+00 : bf16
    %27 = vector.broadcast %cst : bf16 to vector<10x256xbf16>
    %c54 = arith.constant 54 : index
    %c0_14 = arith.constant 0 : index
    %28 = vector.load %arg10[%c54, %c0_14] : memref<64x256xbf16, #tpu.memory_space<vmem>>, vector<10x256xbf16>
    tpu.vector_store %arg10[%c54, %c0_14], %27 {strides = array<i32>} : memref<64x256xbf16, #tpu.memory_space<vmem>>, vector<10x256xbf16>,
    %cst_15 = arith.constant 1.000000e+00 : bf16
    %29 = vector.broadcast %cst_15 : bf16 to vector<1x256xbf16>
    %c54_16 = arith.constant 54 : index
    %c0_17 = arith.constant 0 : index
    %30 = vector.load %arg10[%c54_16, %c0_17] : memref<64x256xbf16, #tpu.memory_space<vmem>>, vector<1x256xbf16>
    tpu.vector_store %arg10[%c54_16, %c0_17], %29 {strides = array<i32>} : memref<64x256xbf16, #tpu.memory_space<vmem>>, vector<1x256xbf16>,
    %c0_18 = arith.constant 0 : index
    %c0_19 = arith.constant 0 : index
    %31 = vector.load %arg4[%c0_18, %c0_19] : memref<128x64xbf16, #tpu.memory_space<vmem>>, vector<128x64xbf16>
    %c0_20 = arith.constant 0 : index
    %c0_21 = arith.constant 0 : index
    %32 = vector.load %arg10[%c0_20, %c0_21] : memref<64x256xbf16, #tpu.memory_space<vmem>>, vector<64x256xbf16>
    %cst_22 = arith.constant dense<0.000000e+00> : vector<128x256xf32>
    %33 = tpu.matmul %31, %32, %cst_22 {dimension_numbers = #tpu.dot_dimension_numbers<[1], [0], [0], [1], [0, 0, 1, 1], [], []>} : vector<128x64xbf16>, vector<64x256xbf16>, vector<128x256xf32> -> vector<128x256xf32>
    %cst_23 = arith.constant 0.000000e+00 : f32
    %34 = vector.broadcast %cst_23 : f32 to vector<128x256xf32>
    %35 = arith.maximumf %33, %34 : vector<128x256xf32>
    %36 = arith.truncf %35 : vector<128x256xf32> to vector<128x256xbf16>
    %c0_24 = arith.constant 0 : index
    %c0_25 = arith.constant 0 : index
    %37 = vector.load %arg5[%c0_24, %c0_25] : memref<9x128xbf16, #tpu.memory_space<vmem>>, vector<9x128xbf16>
    %cst_26 = arith.constant dense<0.000000e+00> : vector<9x256xf32>
    %38 = tpu.matmul %37, %36, %cst_26 {dimension_numbers = #tpu.dot_dimension_numbers<[1], [0], [0], [1], [0, 0, 1, 1], [], []>} : vector<9x128xbf16>, vector<128x256xbf16>, vector<9x256xf32> -> vector<9x256xf32>
    %39 = vector.extract_strided_slice %1 {offsets = [0, 128], sizes = [6, 256], strides = [1, 1]} : vector<6x512xbf16> to vector<6x256xbf16>
    %40 = arith.extf %39 : vector<6x256xbf16> to vector<6x256xf32>
    %41 = vector.extract_strided_slice %38 {offsets = [0, 0], sizes = [6, 256], strides = [1, 1]} : vector<9x256xf32> to vector<6x256xf32>
    %42 = arith.addf %40, %41 : vector<6x256xf32>
    %c0_27 = arith.constant 0 : index
    %c0_28 = arith.constant 0 : index
    %43 = vector.load %arg6[%c0_27, %c0_28] : memref<3x6xf32, #tpu.memory_space<vmem>>, vector<3x6xf32>
    %cst_29 = arith.constant 0.000000e+00 : f32
    %44 = vector.broadcast %cst_29 : f32 to vector<3x256xf32>
    %45 = vector.extract_strided_slice %43 {offsets = [0, 0], sizes = [3, 1], strides = [1, 1]} : vector<3x6xf32> to vector<3x1xf32>
    %46 = vector.extract_strided_slice %40 {offsets = [0, 0], sizes = [1, 256], strides = [1, 1]} : vector<6x256xf32> to vector<1x256xf32>
    %47 = vector.broadcast %45 : vector<3x1xf32> to vector<3x256xf32>
    %48 = vector.broadcast %46 : vector<1x256xf32> to vector<3x256xf32>
    %49 = arith.mulf %47, %48 : vector<3x256xf32>
    %50 = arith.addf %44, %49 : vector<3x256xf32>
    %51 = vector.extract_strided_slice %43 {offsets = [0, 1], sizes = [3, 1], strides = [1, 1]} : vector<3x6xf32> to vector<3x1xf32>
    %52 = vector.extract_strided_slice %40 {offsets = [1, 0], sizes = [1, 256], strides = [1, 1]} : vector<6x256xf32> to vector<1x256xf32>
    %53 = vector.broadcast %51 : vector<3x1xf32> to vector<3x256xf32>
    %54 = vector.broadcast %52 : vector<1x256xf32> to vector<3x256xf32>
    %55 = arith.mulf %53, %54 : vector<3x256xf32>
    %56 = arith.addf %50, %55 : vector<3x256xf32>
    %57 = vector.extract_strided_slice %43 {offsets = [0, 2], sizes = [3, 1], strides = [1, 1]} : vector<3x6xf32> to vector<3x1xf32>
    %58 = vector.extract_strided_slice %40 {offsets = [2, 0], sizes = [1, 256], strides = [1, 1]} : vector<6x256xf32> to vector<1x256xf32>
    %59 = vector.broadcast %57 : vector<3x1xf32> to vector<3x256xf32>
    %60 = vector.broadcast %58 : vector<1x256xf32> to vector<3x256xf32>
    %61 = arith.mulf %59, %60 : vector<3x256xf32>
    %62 = arith.addf %56, %61 : vector<3x256xf32>
    %63 = vector.extract_strided_slice %43 {offsets = [0, 3], sizes = [3, 1], strides = [1, 1]} : vector<3x6xf32> to vector<3x1xf32>
    %64 = vector.extract_strided_slice %40 {offsets = [3, 0], sizes = [1, 256], strides = [1, 1]} : vector<6x256xf32> to vector<1x256xf32>
    %65 = vector.broadcast %63 : vector<3x1xf32> to vector<3x256xf32>
    %66 = vector.broadcast %64 : vector<1x256xf32> to vector<3x256xf32>
    %67 = arith.mulf %65, %66 : vector<3x256xf32>
    %68 = arith.addf %62, %67 : vector<3x256xf32>
    %69 = vector.extract_strided_slice %43 {offsets = [0, 4], sizes = [3, 1], strides = [1, 1]} : vector<3x6xf32> to vector<3x1xf32>
    %70 = vector.extract_strided_slice %40 {offsets = [4, 0], sizes = [1, 256], strides = [1, 1]} : vector<6x256xf32> to vector<1x256xf32>
    %71 = vector.broadcast %69 : vector<3x1xf32> to vector<3x256xf32>
    %72 = vector.broadcast %70 : vector<1x256xf32> to vector<3x256xf32>
    %73 = arith.mulf %71, %72 : vector<3x256xf32>
    %74 = arith.addf %68, %73 : vector<3x256xf32>
    %75 = vector.extract_strided_slice %43 {offsets = [0, 5], sizes = [3, 1], strides = [1, 1]} : vector<3x6xf32> to vector<3x1xf32>
    %76 = vector.extract_strided_slice %40 {offsets = [5, 0], sizes = [1, 256], strides = [1, 1]} : vector<6x256xf32> to vector<1x256xf32>
    %77 = vector.broadcast %75 : vector<3x1xf32> to vector<3x256xf32>
    %78 = vector.broadcast %76 : vector<1x256xf32> to vector<3x256xf32>
    %79 = arith.mulf %77, %78 : vector<3x256xf32>
    %80 = arith.addf %74, %79 : vector<3x256xf32>
    %c0_30 = arith.constant 0 : index
    %c0_31 = arith.constant 0 : index
    %c0_32 = arith.constant 0 : index
    %81 = vector.load %arg7[%c0_30, %c0_31, %c0_32] : memref<1x9x1xf32, #tpu.memory_space<vmem>>, vector<1x9x1xf32>
    %82 = vector.shape_cast %81 : vector<1x9x1xf32> to vector<9x1xf32>
    %83 = vector.extract_strided_slice %82 {offsets = [0, 0], sizes = [6, 1], strides = [1, 1]} : vector<9x1xf32> to vector<6x1xf32>
    %84 = vector.broadcast %83 : vector<6x1xf32> to vector<6x256xf32>
    %85 = arith.addf %42, %84 : vector<6x256xf32>
    %c0_33 = arith.constant 0 : index
    %c0_34 = arith.constant 0 : index
    %c0_35 = arith.constant 0 : index
    %86 = vector.load %arg8[%c0_33, %c0_34, %c0_35] : memref<1x6x256xf32, #tpu.memory_space<vmem>>, vector<1x6x256xf32>
    %87 = vector.shape_cast %86 : vector<1x6x256xf32> to vector<6x256xf32>
    %88 = vector.shape_cast %85 : vector<6x256xf32> to vector<1x6x256xf32>
    tpu.vector_store %arg8[%c0_33, %c0_34, %c0_35], %88 {strides = array<i32>} : memref<1x6x256xf32, #tpu.memory_space<vmem>>, vector<1x6x256xf32>,
    %89 = vector.extract_strided_slice %38 {offsets = [6, 0], sizes = [3, 256], strides = [1, 1]} : vector<9x256xf32> to vector<3x256xf32>
    %90 = arith.addf %80, %89 : vector<3x256xf32>
    %91 = vector.extract_strided_slice %82 {offsets = [6, 0], sizes = [3, 1], strides = [1, 1]} : vector<9x1xf32> to vector<3x1xf32>
    %92 = vector.broadcast %91 : vector<3x1xf32> to vector<3x256xf32>
    %93 = arith.addf %90, %92 : vector<3x256xf32>
    %c0_36 = arith.constant 0 : index
    %c0_37 = arith.constant 0 : index
    %c0_38 = arith.constant 0 : index
    %94 = vector.load %arg9[%c0_36, %c0_37, %c0_38] : memref<1x3x256xf32, #tpu.memory_space<vmem>>, vector<1x3x256xf32>
    %95 = vector.shape_cast %94 : vector<1x3x256xf32> to vector<3x256xf32>
    %96 = vector.shape_cast %93 : vector<3x256xf32> to vector<1x3x256xf32>
    tpu.vector_store %arg9[%c0_36, %c0_37, %c0_38], %96 {strides = array<i32>} : memref<1x3x256xf32, #tpu.memory_space<vmem>>, vector<1x3x256xf32>,
    return
  }
  func.func @transform_0(%arg0: i32, %arg1: i32) -> (i32, i32, i32) {
    %c0_i32 = arith.constant 0 : i32
    %c0_i32_0 = arith.constant 0 : i32
    %c0_i32_1 = arith.constant 0 : i32
    return %arg0, %c0_i32, %c0_i32_0 : i32, i32, i32
  }
  func.func @transform_1(%arg0: i32, %arg1: i32) -> (i32, i32) {
    %c0_i32 = arith.constant 0 : i32
    %c0_i32_0 = arith.constant 0 : i32
    %c0_i32_1 = arith.constant 0 : i32
    return %c0_i32, %c0_i32_0 : i32, i32
  }
  func.func @transform_2(%arg0: i32, %arg1: i32) -> (i32, i32) {
    %c0_i32 = arith.constant 0 : i32
    %c0_i32_0 = arith.constant 0 : i32
    %c0_i32_1 = arith.constant 0 : i32
    return %c0_i32, %c0_i32_0 : i32, i32
  }
  func.func @transform_3(%arg0: i32, %arg1: i32) -> (i32, i32) {
    %c0_i32 = arith.constant 0 : i32
    %c0_i32_0 = arith.constant 0 : i32
    %c0_i32_1 = arith.constant 0 : i32
    return %c0_i32, %c0_i32_0 : i32, i32
  }
  func.func @transform_4(%arg0: i32, %arg1: i32) -> (i32, i32) {
    %c0_i32 = arith.constant 0 : i32
    %c0_i32_0 = arith.constant 0 : i32
    %c0_i32_1 = arith.constant 0 : i32
    return %c0_i32, %c0_i32_0 : i32, i32
  }
  func.func @transform_5(%arg0: i32, %arg1: i32) -> (i32, i32, i32) {
    %c0_i32 = arith.constant 0 : i32
    %c0_i32_0 = arith.constant 0 : i32
    %c0_i32_1 = arith.constant 0 : i32
    return %arg0, %c0_i32, %c0_i32_0 : i32, i32, i32
  }
  func.func @transform_6(%arg0: i32, %arg1: i32) -> (i32, i32, i32) {
    %c0_i32 = arith.constant 0 : i32
    %c0_i32_0 = arith.constant 0 : i32
    return %arg0, %c0_i32, %arg1 : i32, i32, i32
  }
  func.func @transform_7(%arg0: i32, %arg1: i32) -> (i32, i32, i32) {
    %c0_i32 = arith.constant 0 : i32
    %c0_i32_0 = arith.constant 0 : i32
    return %arg0, %c0_i32, %arg1 : i32, i32, i32
  }
}

</mosaic_0001>

<bundles_post_ra>
// kernel: tpu_custom_call.1
= control target key start
LH: loop header
LB: loop body
LE: loop exit
PB: predicated region body
PF: predicated region fallthrough
CT: control target
= control target key end

     0   :  { %s1402_s24 = smov 0   ;;  %s1404_s25 = smov 0   ;;  %s1582_s0 = inlined_call_operand.vmem [shape: bf16[2,6,512], index: 0, kind: input, shape index: {}]   ;;  %s1583_s1 = inlined_call_operand.vmem [shape: bf16[2,512], index: 1, kind: input, shape index: {}]   ;;  %s1584_s2 = inlined_call_operand.vmem [shape: bf16[128,64], index: 2, kind: input, shape index: {}]   ;;  %s1585_s3 = inlined_call_operand.vmem [shape: bf16[9,128], index: 3, kind: input, shape index: {}]   ;;  %s1586_s4 = inlined_call_operand.vmem [shape: f32[3,6], index: 4, kind: input, shape index: {}]   ;;  %s1587_s5 = inlined_call_operand.vmem [shape: f32[2,9,1], index: 5, kind: input, shape index: {}]   ;;  %s1588_s6 = inlined_call_operand.vmem [shape: f32[2,6,256], index: 6, kind: output, shape index: {0}]   ;;  %s1589_s7 = inlined_call_operand.vmem [shape: f32[2,3,256], index: 7, kind: output, shape index: {1}]  }
   0x1   :  { %s1406_s26 = smov 0  }
   0x2 LB: > { %s30_s27 = sadd.s32 1, %s1342_s25  ;;  %p1153_p0 = scmp.ge.s32.totalorder %s1346_s26, 1  ;;  %s1346_s26 = sphi %s1406_s26, %s18_s26   ;;  %s1342_s25 = sphi %s1404_s25, %s1591_s25   ;;  %s1338_s24 = sphi %s1402_s24, %s1590_s24  }
   0x3   : > { %p32_p1 = scmp.ge.s32.totalorder %s30_s27, 2  ;;  %p266_p2 = scmp.lt.s32.totalorder %s1346_s26, 3 }
   0x5   : > { %s1593_s27 = smov (%p32_p1, %s30_s27), 0  ;;  %p267_p3 = pnand %p1153_p0, %p266_p2 }
   0x6   : > { %p316_p4 = scmp.lt.s32.totalorder (!%p267_p3), %s1338_s24, 1  ;;  %s1348_s11 = smov (!%p267_p3), 112  }
   0x7   : > { %270 = sbr.rel (%p267_p3) target bundleno = 596 (0x254), region = 44  ;;  %s1349_s12 = smov (!%p267_p3), 113  }
   0x8   : > { %s1350_s13 = smov (!%p267_p3), 1   ;;  %s1351_s14 = smov (!%p267_p3), 111  }
   0x9   : > { %s1352_s15 = smov (!%p267_p3), 127   ;;  %s1353_s16 = smov (!%p267_p3), 15  }
   0xa   : > { %s1354_s17 = smov (!%p267_p3), 17   ;;  %s1355_s18 = smov (!%p267_p3), 16  }
   0xc   : > { %v350_v0 = vld [vmem:[%s1583_s1] sm:$0xf]  ;;  %s1595_s24 = smov (!%p316_p4, %s1338_s24), 1  ;;  %vm422_vm0 = vcmask 1043456   ;;  %vm542_vm1 = vcmask 924672   ;;  %vm576_vm2 = vcmask 1043459  }
   0xd   : > { %352 = vst [vmem:[#allocation1] ss:$9 sm:$0xff] %v350_v0  ;;  %s1426_s30 = sshll.u32 %s1595_s24, 4  ;;  %vm577_vm3 = vsmask.f32 3328  ;;  %vm579_vm4 = vcmask 1047559  }
   0xe   : > { %s320_s10 = scalar_lea.vmem %s1582_s0, %s1426_s30  ;;  %vm559_vm5 = vcmask 916480   ;;  %vm578_vm6 = vmand %vm576_vm2, %vm577_vm3  ;;  %vm580_vm7 = vsmask.f32 7424  ;;  %vm570_vm10 = vcmask 908288   ;;  %vm517_vm11 = vcmask 1039360   ;;  %s325_s21 = scalar_lea.vmem %s1587_s5, %s1426_s30 }
   0xf   : > { %v1432_v1 = vld [vmem:[%s320_s10 + $0x8] sm:$0x77]  ;;  %v1434_v2 = vld [vmem:[%s320_s10] sm:$0x77]  ;;  %vm581_vm8 = vmand %vm579_vm4, %vm580_vm7  ;;  %vm491_vm12 = vcmask 7168   ;;  %vm474_vm13 = vcmask 121856   ;;  %s334_s10 = scalar_lea.vmem %s1588_s6, %s1426_s30 }
  0x10   : > { %v551_v3 = vrot.slane %v1432_v1, 7  ;;  %v495_v4 = vrot.slane %v1434_v2, 4  ;;  %v496_v5 = vrot.slane %v1432_v1, 4  ;;  %v550_v9 = vrot.slane %v1434_v2, 7  ;;  %vm582_vm9 = vmor %vm581_vm8, %vm578_vm6  ;;  %s1251_s30 = sshll.u32 %s1595_s24, 3 }
  0x11   : > { %v371_v15 = vunpack.c.l.bf16 %v1432_v1  ;;  %v372_v16 = vunpack.c.h.bf16 %v1432_v1  ;;  %v369_v21 = vunpack.c.l.bf16 %v1434_v2  ;;  %v370_v23 = vunpack.c.h.bf16 %v1434_v2 }
  0x12   : > { %554 = vrot.lane.b32.xlu0 %v551_v3, %s1348_s11  ;;  %v1441_v10 = vsel %vm422_vm0, %v495_v4, %v496_v5  ;;  %552 = vrot.lane.b32.xlu2 %v550_v9, %s1348_s11  ;;  %vm424_vm14 = vcmask 138240   ;;  %vm447_vm15 = vcmask 130048   ;;  %vm978_vm2 = vcmask 1041408  }
  0x13   : > { %499 = vst [vmem:[#allocation2 + $0x18] sm:$0x77] %v1441_v10 }
  0x14   : > { %v355_v6 = vld [vmem:[#allocation1 + $0x12] sm:$0xff]  ;;  %v356_v7 = vld [vmem:[#allocation1 + $0x1b] sm:$0xff]  ;;  %v354_v13 = vld [vmem:[#allocation1 + $0x9] sm:$0xff] }
  0x15   : > { %v353_v8 = vld [vmem:[#allocation1] sm:$0xff]  ;;  %v363_v11 = vpack.i.b16 %v355_v6, %v355_v6  ;;  %v366_v12 = vpack.i.b16 %v356_v7, %v356_v7  ;;  %v360_v17 = vpack.i.b16 %v354_v13, %v354_v13  ;;  %v430_v13 = vrot.slane %v1434_v2, 5 }
  0x16   : > { %v357_v14 = vpack.i.b16 %v353_v8, %v353_v8  ;;  %383 = vst [vmem:[#allocation1] ss:$9 sm:$0xff] %v350_v0 }
  0x17   : > { %v365_v18 = vperm.slane %v363_v11, 0  ;;  %v368_v19 = vperm.slane %v366_v12, 0  ;;  %v362_v22 = vperm.slane %v360_v17, 0 }
  0x18   : > { %v359_v20 = vperm.slane %v357_v14, 0  ;;  %v432_v14 = vrot.slane %v430_v13, 4 }
  0x19   : > { %v375_v24 = vunpack.c.l.bf16 %v365_v18  ;;  %v376_v25 = vunpack.c.l.bf16 %v368_v19  ;;  %v374_v27 = vunpack.c.l.bf16 %v362_v22  ;;  %v1356_v19 = vmov 0  }
  0x1a   : > { %v373_v26 = vunpack.c.l.bf16 %v359_v20  ;;  %574 = vst [vmem:[#allocation2 + $0x30] sm:$0x88] %v1356_v19  ;;  %1315 = vset.pattern.permute.xlu0 %v1356_v19 }
  0x1b   : > { %v379_v28 = vmul.f32 %v375_v24, %v371_v15  ;;  %v380_v29 = vmul.f32 %v376_v25, %v372_v16  ;;  %v378_v31 = vmul.f32 %v374_v27, %v370_v23  ;;  %575 = vst [vmem:[#allocation2 + $0x38] sm:$0xff] %v1356_v19 }
  0x1c   : > { %v377_v30 = vmul.f32 %v373_v26, %v369_v21 }
  0x1d   : > { %v382_v32 = vpack.c.bf16 %v380_v29, %v379_v28  ;;  %v384_v34 = vld [vmem:[#allocation1] sm:$0xff]  ;;  %v385_v35 = vld [vmem:[#allocation1 + $0x9] sm:$0xff]  ;;  %v386_v36 = vld [vmem:[#allocation1 + $0x12] sm:$0xff] }
  0x1e   : > { %v1448_v33 = vpack.c.bf16 %v378_v31, %v377_v30  ;;  %v388_v38 = vshrl.u32 %v384_v34, 16  ;;  %v392_v39 = vshrl.u32 %v385_v35, 16  ;;  %v387_v40 = vld [vmem:[#allocation1 + $0x1b] sm:$0xff]  ;;  %v396_v42 = vshrl.u32 %v386_v36, 16 }
  0x1f   : > { %v526_v37 = vrot.slane %v382_v32, 6  ;;  %v400_v43 = vshrl.u32 %v387_v40, 16  ;;  %v483_v56 = vrot.slane %v382_v32, 7 }
  0x20   : > { %v525_v41 = vrot.slane %v1448_v33, 6  ;;  %v389_v45 = vpack.i.b16 %v388_v38, %v388_v38  ;;  %v393_v46 = vpack.i.b16 %v392_v39, %v392_v39  ;;  %v397_v48 = vpack.i.b16 %v396_v42, %v396_v42 }
  0x21   : > { %v528_v44 = vrot.slane %v526_v37, 4  ;;  %v401_v49 = vpack.i.b16 %v400_v43, %v400_v43  ;;  %v482_v7 = vrot.slane %v1448_v33, 7  ;;  %v583_v26 = vld [vmem:[#allocation2 + $0x30] sm:$0x88] }
  0x22   : > { %v527_v47 = vrot.slane %v525_v41, 4  ;;  %529 = vrot.lane.b32.xlu2 %v525_v41, %s1349_s12  ;;  %v391_v50 = vperm.slane %v389_v45, 0  ;;  %v395_v51 = vperm.slane %v393_v46, 0  ;;  %v399_v52 = vperm.slane %v397_v48, 0 }
  0x23   : > { %535 = vrot.lane.b32.xlu1 %v528_v44, %s1349_s12  ;;  %v403_v53 = vperm.slane %v401_v49, 0  ;;  %v584_v29 = vsel %vm582_vm9, 1065369472, %v583_v26 }
  0x24   : > { %533 = vrot.lane.b32.xlu0 %v527_v47, %s1349_s12  ;;  %v404_v54 = vunpack.c.l.bf16 %v391_v50  ;;  %v405_v55 = vunpack.c.l.bf16 %v395_v51  ;;  %v406_v59 = vunpack.c.l.bf16 %v399_v52  ;;  %585 = vst [vmem:[#allocation2 + $0x30] sm:$0x88] %v584_v29 }
  0x25   : > { %v407_v60 = vunpack.c.l.bf16 %v403_v53  ;;  %v1267_v53 = vld [vmem:[#allocation2 + $0x34] sm:$0xf0] }
  0x26   : > { %v408_v57 = vmul.f32 %v404_v54, %v369_v21  ;;  %v409_v58 = vmul.f32 %v405_v55, %v370_v23  ;;  %v410_v63 = vmul.f32 %v406_v59, %v371_v15  ;;  %v431_v15 = vrot.slane %v1432_v1, 5  ;;  %v1222_v54 = vld [vmem:[#allocation2 + $0x38] sm:$0xf0] }
  0x27   : > { %v411_v0 = vmul.f32 %v407_v60, %v372_v16 }
  0x28   : > { %v412_v61 = vpack.c.bf16 %v409_v58, %v408_v57  ;;  %v433_v16 = vrot.slane %v431_v15, 4 }
  0x29   : > { %v413_v4 = vpack.c.bf16 %v411_v0, %v410_v63 }
  0x2a   : > { %531 = vrot.lane.b32.xlu2 %v526_v37, %s1349_s12  ;;  %v500_v62 = vrot.slane %v412_v61, 5  ;;  %v457_v11 = vrot.slane %v412_v61, 6 }
  0x2b   : > { %486 = vrot.lane.b32.xlu1 %v483_v56, %s1350_s13  ;;  %v501_v5 = vrot.slane %v413_v4, 5  ;;  %v458_v8 = vrot.slane %v413_v4, 6 }
  0x2c   : > { %563 = vrot.lane.b32.xlu0 %v412_v61, %s1351_s14  ;;  %v502_v3 = vrot.slane %v500_v62, 4  ;;  %v459_v12 = vrot.slane %v457_v11, 4 }
  0x2d   : > { %v503_v6 = vrot.slane %v501_v5, 4  ;;  %v460_v9 = vrot.slane %v458_v8, 4 }
  0x32   : > { %504 = vrot.lane.b32.xlu2 %v500_v62, %s1352_s15 }
  0x33   : > { %508 = vrot.lane.b32.xlu1 %v502_v3, %s1352_s15 }
  0x34   : > { %565 = vrot.lane.b32.xlu0 %v413_v4, %s1351_s14 }
  0x3a   : > { %467 = vrot.lane.b32.xlu2 %v460_v9, %s1353_s16 }
  0x3b   : > { %510 = vrot.lane.b32.xlu1 %v503_v6, %s1352_s15 }
  0x3c   : > { %484 = vrot.lane.b32.xlu0 %v482_v7, %s1350_s13  ;;  %s344_s13 = scalar_lea.vmem %s1589_s7, %s1251_s30 }
  0x42   : > { %418 = vrot.lane.b32.xlu2 %v382_v32, %s1354_s17 }
  0x43   : > { %465 = vrot.lane.b32.xlu1 %v459_v12, %s1353_s16 }
  0x44   : > { %506 = vrot.lane.b32.xlu0 %v501_v5, %s1352_s15 }
  0x4a   : > { %438 = vrot.lane.b32.xlu2 %v432_v14, %s1355_s18 }
  0x4b   : > { %416 = vrot.lane.b32.xlu1 %v1448_v33, %s1354_s17 }
  0x4c   : > { %434 = vrot.lane.b32.xlu0 %v430_v13, %s1355_s18 }
  0x52   : > { %463 = vrot.lane.b32.xlu2 %v458_v8, %s1353_s16 }
  0x53   : > { %436 = vrot.lane.b32.xlu1 %v431_v15, %s1355_s18 }
  0x54   : > { %440 = vrot.lane.b32.xlu0 %v433_v16, %s1355_s18 }
  0x5b   : > { %461 = vrot.lane.b32.xlu1 %v457_v11, %s1353_s16 }
  0x6c   : > { %v553_v17 = vpop.permute.xlu2 %552 }
  0x6d   : > { %v556_v22 = vrot.slane %v553_v17, 4 }
  0x7c   : > { %v530_v18 = vpop.permute.xlu2 %529 }
  0x7d   : > { %v537_v2 = vrot.slane %v530_v18, 4 }
  0x84   : > { %v532_v20 = vpop.permute.xlu2 %531  ;;  %v555_v1 = vpop.permute.xlu0 %554 }
  0x85   : > { %v538_v21 = vrot.slane %v532_v20, 4  ;;  %v557_v24 = vrot.slane %v555_v1, 4 }
  0x87   : > { %v541_v23 = vsel %vm422_vm0, %v537_v2, %v538_v21  ;;  %v558_v27 = vsel %vm422_vm0, %v556_v22, %v557_v24 }
  0x88   : > { %v543_v25 = vsel %vm542_vm1, %v541_v23, %v532_v20  ;;  %v560_v28 = vsel %vm559_vm5, %v558_v27, %v555_v1 }
  0x89   : > { %548 = vst [vmem:[#allocation2 + $0x20] sm:$0xcc] %v543_v25 }
  0x8a   : > { %562 = vst [vmem:[#allocation2 + $0x28] sm:$0xee] %v560_v28 }
  0x8c   : > { %v505_v38 = vpop.permute.xlu2 %504 }
  0x8d   : > { %v512_v5 = vrot.slane %v505_v38, 4 }
  0x94   : > { %v468_v45 = vpop.permute.xlu2 %467 }
  0x95   : > { %v536_v30 = vpop.permute.xlu1 %535  ;;  %v472_v62 = vrot.slane %v468_v45, 4 }
  0x96   : > { %v540_v31 = vrot.slane %v536_v30, 4  ;;  %v534_v32 = vpop.permute.xlu0 %533 }
  0x97   : > { %v539_v33 = vrot.slane %v534_v32, 4 }
  0x99   : > { %v544_v34 = vsel %vm422_vm0, %v539_v33, %v540_v31 }
  0x9a   : > { %v545_v35 = vsel %vm542_vm1, %v544_v34, %v536_v30  ;;  %vm690_vm1 = vcmask 523264  }
  0x9b   : > { %549 = vst [vmem:[#allocation2 + $0x28] sm:$0x11] %v545_v35 }
  0x9c   : > { %v419_v0 = vpop.permute.xlu2 %418 }
  0x9d   : > { %v487_v36 = vpop.permute.xlu1 %486  ;;  %v421_v18 = vrot.slane %v419_v0, 4 }
  0x9e   : > { %v564_v37 = vpop.permute.xlu0 %563  ;;  %v489_v50 = vrot.slane %v487_v36, 4 }
  0x9f   : > { %v567_v39 = vrot.slane %v564_v37, 4 }
  0xa2   : > { %v1265_v8 = vld [vmem:[#allocation2 + $0x24] sm:$0xf0]  ;;  %v1214_v14 = vld [vmem:[#allocation2 + $0x28] sm:$0xf0] }
  0xa4   : > { %v439_v22 = vpop.permute.xlu2 %438 }
  0xa5   : > { %v509_v40 = vpop.permute.xlu1 %508  ;;  %v444_v32 = vrot.slane %v439_v22, 4 }
  0xa6   : > { %v566_v41 = vpop.permute.xlu0 %565  ;;  %v514_v47 = vrot.slane %v509_v40, 4 }
  0xa7   : > { %v568_v42 = vrot.slane %v566_v41, 4 }
  0xa9   : > { %v569_v43 = vsel %vm422_vm0, %v567_v39, %v568_v42 }
  0xaa   : > { %v571_v44 = vsel %vm570_vm10, %v569_v43, %v566_v41 }
  0xab   : > { %573 = vst [vmem:[#allocation2 + $0x30] sm:$0x77] %v571_v44 }
  0xac   : > { %v464_v39 = vpop.permute.xlu2 %463 }
  0xad   : > { %v511_v46 = vpop.permute.xlu1 %510  ;;  %v470_v41 = vrot.slane %v464_v39, 4 }
  0xae   : > { %v515_v48 = vrot.slane %v511_v46, 4  ;;  %v485_v49 = vpop.permute.xlu0 %484 }
  0xaf   : > { %v488_v51 = vrot.slane %v485_v49, 4 }
  0xb0   : > { %v519_v52 = vsel %vm422_vm0, %v514_v47, %v515_v48 }
  0xb1   : > { %v520_v55 = vsel %vm517_vm11, %v519_v52, %v511_v46  ;;  %v490_v56 = vsel %vm422_vm0, %v488_v51, %v489_v50  ;;  %v1252_v52 = vld [vmem:[%s1584_s2] sm:$0xff] }
  0xb2   : > { %524 = vst [vmem:[#allocation2 + $0x20] sm:$0x33] %v520_v55  ;;  %v492_v57 = vsel %vm491_vm12, %v485_v49, %v490_v56  ;;  %v1220_v58 = vld [vmem:[#allocation2 + $0x30] sm:$0xf]  ;;  %v1266_v59 = vld [vmem:[#allocation2 + $0x34] sm:$0xf] }
  0xb3   : > { %494 = vst [vmem:[#allocation2 + $0x10] sm:$0xee] %v492_v57  ;;  %v1221_v60 = vor.u32 %v1267_v53, %v1220_v58  ;;  %v1225_v61 = vor.u32 %v1266_v59, %v1222_v54  ;;  %v1257_v53 = vld [vmem:[%s1584_s2 + $0x28] sm:$0xff]  ;;  %v1258_v55 = vld [vmem:[%s1584_s2 + $0x30] sm:$0xff]  ;;  %v1259_v57 = vld [vmem:[%s1584_s2 + $0x38] sm:$0xff] }
  0xb4   : > { %v1253_v54 = vld [vmem:[%s1584_s2 + $0x8] sm:$0xff]  ;;  %v1254_v56 = vld [vmem:[%s1584_s2 + $0x10] sm:$0xff]  ;;  %v1255_v58 = vld [vmem:[%s1584_s2 + $0x18] sm:$0xff] }
  0xb5   : > { %719 = vmatpush.bf16.msra.mxu0 %v1221_v60  ;;  %1269 = vmatpush.bf16.msra.mxu2 %v1221_v60  ;;  %v466_v63 = vpop.permute.xlu1 %465  ;;  %v1256_v59 = vld [vmem:[%s1584_s2 + $0x20] sm:$0xff] }
  0xb6   : > { %768 = vmatpush.bf16.msra.mxu1 %v1225_v61  ;;  %1273 = vmatpush.bf16.msra.mxu3 %v1225_v61  ;;  %v471_v3 = vrot.slane %v466_v63, 4  ;;  %v507_v4 = vpop.permute.xlu0 %506 }
  0xb7   : > { %v513_v6 = vrot.slane %v507_v4, 4 }
  0xb8   : > { %v476_v7 = vsel %vm422_vm0, %v471_v3, %v472_v62 }
  0xb9   : > { %v477_v9 = vsel %vm474_vm13, %v466_v63, %v476_v7  ;;  %v516_v11 = vsel %vm422_vm0, %v512_v5, %v513_v6  ;;  %v1212_v12 = vld [vmem:[#allocation2 + $0x20] sm:$0xf]  ;;  %v1264_v13 = vld [vmem:[#allocation2 + $0x24] sm:$0xf] }
  0xba   : > { %481 = vst [vmem:[#allocation2 + $0x10] sm:$0x11] %v477_v9  ;;  %v518_v15 = vsel %vm517_vm11, %v516_v11, %v507_v4  ;;  %v1213_v16 = vor.u32 %v1265_v8, %v1212_v12  ;;  %v1217_v17 = vor.u32 %v1264_v13, %v1214_v14 }
  0xbb   : > { %523 = vst [vmem:[#allocation2 + $0x18] sm:$0x88] %v518_v15 }
  0xbc   : > { %720 = vmatpush.bf16.msra.mxu0 %v1213_v16  ;;  %1270 = vmatpush.bf16.msra.mxu2 %v1213_v16 }
  0xbd   : > { %769 = vmatpush.bf16.msra.mxu1 %v1217_v17  ;;  %1274 = vmatpush.bf16.msra.mxu3 %v1217_v17  ;;  %v417_v2 = vpop.permute.xlu1 %416 }
  0xbe   : > { %v420_v20 = vrot.slane %v417_v2, 4  ;;  %v435_v21 = vpop.permute.xlu0 %434 }
  0xbf   : > { %v442_v30 = vrot.slane %v435_v21, 4 }
  0xc0   : > { %v423_v1 = vsel %vm422_vm0, %v420_v20, %v421_v18 }
  0xc1   : > { %v425_v23 = vsel %vm424_vm14, %v417_v2, %v423_v1  ;;  %v1204_v24 = vld [vmem:[#allocation2 + $0x10] sm:$0xf]  ;;  %v1262_v25 = vld [vmem:[#allocation2 + $0x14] sm:$0xf] }
  0xc2   : > { %427 = vst [vmem:[#allocation2] sm:$0x77] %v425_v23  ;;  %v1263_v26 = vld [vmem:[#allocation2 + $0x14] sm:$0xf0]  ;;  %v1206_v27 = vld [vmem:[#allocation2 + $0x18] sm:$0xf0] }
  0xc3   : > { %v1205_v28 = vor.u32 %v1263_v26, %v1204_v24  ;;  %v1209_v29 = vor.u32 %v1262_v25, %v1206_v27 }
  0xc5   : > { %721 = vmatpush.bf16.msra.mxu0 %v1205_v28  ;;  %1271 = vmatpush.bf16.msra.mxu2 %v1205_v28  ;;  %v437_v31 = vpop.permute.xlu1 %436 }
  0xc6   : > { %770 = vmatpush.bf16.msra.mxu1 %v1209_v29  ;;  %1275 = vmatpush.bf16.msra.mxu3 %v1209_v29  ;;  %v443_v33 = vrot.slane %v437_v31, 4  ;;  %v441_v34 = vpop.permute.xlu0 %440 }
  0xc7   : > { %v445_v35 = vrot.slane %v441_v34, 4 }
  0xc8   : > { %v446_v36 = vsel %vm422_vm0, %v442_v30, %v443_v33 }
  0xc9   : > { %v448_v37 = vsel %vm447_vm15, %v435_v21, %v446_v36  ;;  %v449_v38 = vsel %vm422_vm0, %v444_v32, %v445_v35 }
  0xca   : > { %453 = vst [vmem:[#allocation2] sm:$0x88] %v448_v37  ;;  %v450_v40 = vsel %vm447_vm15, %v439_v22, %v449_v38 }
  0xcb   : > { %454 = vst [vmem:[#allocation2 + $0x8] sm:$0x33] %v450_v40 }
  0xcd   : > { %v462_v42 = vpop.permute.xlu1 %461 }
  0xce   : > { %v469_v43 = vrot.slane %v462_v42, 4 }
  0xd0   : > { %v473_v44 = vsel %vm422_vm0, %v469_v43, %v470_v41 }
  0xd1   : > { %v475_v45 = vsel %vm474_vm13, %v462_v42, %v473_v44  ;;  %v1196_v46 = vld [vmem:[#allocation2] sm:$0xf]  ;;  %v1260_v48 = vld [vmem:[#allocation2 + $0x4] sm:$0xf] }
  0xd2   : > { %480 = vst [vmem:[#allocation2 + $0x8] sm:$0xcc] %v475_v45 }
  0xd9   : > { %v1261_v47 = vld [vmem:[#allocation2 + $0x4] sm:$0xf0]  ;;  %v1198_v49 = vld [vmem:[#allocation2 + $0x8] sm:$0xf0] }
  0xda   : > { %v1197_v50 = vor.u32 %v1261_v47, %v1196_v46  ;;  %v1201_v51 = vor.u32 %v1260_v48, %v1198_v49 }
  0xdc   : > { %722 = vmatpush.bf16.msra.mxu0 %v1197_v50  ;;  %1272 = vmatpush.bf16.msra.mxu2 %v1197_v50 }
  0xdd   : > { %771 = vmatpush.bf16.msra.mxu1 %v1201_v51  ;;  %1276 = vmatpush.bf16.msra.mxu3 %v1201_v51 }
  0xdf   : > { %1226 = vmatmul.msk.bf16.vlgmr.msra.gmra.mxu0 %vm690_vm1, %v1252_v52  ;;  %1231 = vmatmul.msk.bf16.vlgmr.msra.gmra.mxu2 %vm690_vm1, %v1257_v53 }
  0xe0   : > { %1234 = vmatmul.msk.bf16.vlgmr.msra.gmra.mxu1 %vm690_vm1, %v1252_v52  ;;  %1239 = vmatmul.msk.bf16.vlgmr.msra.gmra.mxu3 %vm690_vm1, %v1257_v53  ;;  %v901_v52 = vld [vmem:[%s1586_s4] sm:$0x7]  ;;  %v1357_v53 = vmov 1  }
  0xe1   : > { %1316 = vset.pattern.permute.xlu1 %v1357_v53  ;;  %904 = vperm.xlu0 %1315, %v901_v52  }
  0xe2   : > { %914 = vperm.xlu1 %1316, %v901_v52  }
  0xef   : > { %1227 = vmatmul.msk.bf16.gmra.mxu0 %vm690_vm1, %v1253_v54  ;;  %1232 = vmatmul.msk.bf16.gmra.mxu2 %vm690_vm1, %v1258_v55 }
  0xf0   : > { %1235 = vmatmul.msk.bf16.gmra.mxu1 %vm690_vm1, %v1253_v54  ;;  %1240 = vmatmul.msk.bf16.gmra.mxu3 %vm690_vm1, %v1258_v55  ;;  %v1358_v54 = vmov 2  }
  0xf1   : > { %1317 = vset.pattern.permute.xlu2 %v1358_v54 }
  0xf2   : > { %924 = vperm.xlu2 %1317, %v901_v52  }
  0xff   : > { %1228 = vmatmul.msk.bf16.gmra.mxu0 %vm690_vm1, %v1254_v56  ;;  %1233 = vmatmul.msk.bf16.gmra.mxu2 %vm690_vm1, %v1259_v57 }
 0x100   : > { %1236 = vmatmul.msk.bf16.gmra.mxu1 %vm690_vm1, %v1254_v56  ;;  %1241 = vmatmul.msk.bf16.gmra.mxu3 %vm690_vm1, %v1259_v57 }
 0x10f   : > { %1229 = vmatmul.msk.bf16.gmra.mxu0 %vm690_vm1, %v1255_v58 }
 0x110   : > { %1237 = vmatmul.msk.bf16.gmra.mxu1 %vm690_vm1, %v1255_v58 }
 0x11f   : > { %1230 = vmatmul.msk.bf16.gmra.mxu0 %vm690_vm1, %v1256_v59 }
 0x120   : > { %1238 = vmatmul.msk.bf16.gmra.mxu1 %vm690_vm1, %v1256_v59 }
 0x15c   : > { %v724_v60 = vpop.f32.mrf.mxu0 }
 0x15d   : > { %v773_v61 = vpop.f32.mrf.mxu1  ;;  %v813_v3 = vmax.f32 %v724_v60, 0.0 }
 0x15e   : > { %v814_v6 = vmax.f32 %v773_v61, 0.0  ;;  %v1359_v61 = vmov 5  }
 0x15f   : > { %1320 = vset.pattern.permute.xlu0 %v1359_v61 }
 0x160   : > { %954 = vperm.xlu0 %1320, %v901_v52  }
 0x162   : > { %v749_v62 = vpop.f32.mrf.mxu2 }
 0x163   : > { %v798_v63 = vpop.f32.mrf.mxu3  ;;  %v833_v40 = vmax.f32 %v749_v62, 0.0 }
 0x164   : > { %v726_v0 = vpop.f32.mrf.mxu0  ;;  %v834_v43 = vmax.f32 %v798_v63, 0.0 }
 0x165   : > { %v815_v4 = vmax.f32 %v726_v0, 0.0  ;;  %v775_v5 = vpop.f32.mrf.mxu1  ;;  %v1360_v0 = vmov 3  }
 0x166   : > { %v816_v7 = vmax.f32 %v775_v5, 0.0  ;;  %1318 = vset.pattern.permute.xlu1 %v1360_v0  ;;  %v1361_v5 = vmov 4  }
 0x167   : > { %v1516_v8 = vpack.c.bf16 %v815_v4, %v813_v3  ;;  %934 = vperm.xlu1 %1318, %v901_v52   ;;  %1319 = vset.pattern.permute.xlu2 %v1361_v5 }
 0x168   : > { %v1518_v9 = vpack.c.bf16 %v816_v7, %v814_v6  ;;  %944 = vperm.xlu2 %1319, %v901_v52   ;;  %1323 = vset.pattern.permute.xlu0 %v1356_v19 }
 0x16a   : > { %v751_v11 = vpop.f32.mrf.mxu2 }
 0x16b   : > { %v800_v12 = vpop.f32.mrf.mxu3  ;;  %v835_v41 = vmax.f32 %v751_v11, 0.0 }
 0x16c   : > { %v1520_v13 = vpop.f32.mrf.mxu0  ;;  %v836_v44 = vmax.f32 %v800_v12, 0.0 }
 0x16d   : > { %v1522_v14 = vpop.f32.mrf.mxu1  ;;  %v855_v48 = vpack.c.bf16 %v835_v41, %v833_v40 }
 0x16e   : > { %v856_v49 = vpack.c.bf16 %v836_v44, %v834_v43 }
 0x16f   : > { %1321 = vset.pattern.permute.xlu1 %v1356_v19 }
 0x170   : > { %1322 = vset.pattern.permute.xlu2 %v1356_v19  ;;  %v915_v19 = vpop.permute.xlu1 %914 }
 0x172   : > { %v754_v15 = vpop.f32.mrf.mxu2 }
 0x173   : > { %v803_v16 = vpop.f32.mrf.mxu3  ;;  %v837_v33 = vmax.f32 %v754_v15, 0.0 }
 0x174   : > { %v1524_v17 = vpop.f32.mrf.mxu0  ;;  %v838_v37 = vmax.f32 %v803_v16, 0.0 }
 0x175   : > { %v1526_v18 = vpop.f32.mrf.mxu1 }
 0x17a   : > { %v756_v2 = vpop.f32.mrf.mxu2 }
 0x17b   : > { %v805_v20 = vpop.f32.mrf.mxu3  ;;  %v839_v34 = vmax.f32 %v756_v2, 0.0 }
 0x17c   : > { %v1528_v21 = vpop.f32.mrf.mxu0  ;;  %v840_v38 = vmax.f32 %v805_v20, 0.0 }
 0x17d   : > { %v1530_v22 = vpop.f32.mrf.mxu1  ;;  %v857_v42 = vpack.c.bf16 %v839_v34, %v837_v33  ;;  %v821_v2 = vmax.f32 %v1528_v21, 0.0  ;;  %v818_v21 = vmax.f32 %v1522_v14, 0.0  ;;  %v897_v14 = vunpack.c.l.bf16 %v1441_v10 }
 0x17e   : > { %v858_v45 = vpack.c.bf16 %v840_v38, %v838_v37  ;;  %v822_v20 = vmax.f32 %v1530_v22, 0.0 }
 0x17f   : > { %v907_v33 = vperm.slane %v897_v14, 0  ;;  %v927_v37 = vperm.slane %v897_v14, 2  ;;  %v947_v52 = vperm.slane %v897_v14, 4  ;;  %v957_v61 = vperm.slane %v897_v14, 5 }
 0x182   : > { %v759_v1 = vpop.f32.mrf.mxu2 }
 0x183   : > { %v808_v23 = vpop.f32.mrf.mxu3  ;;  %v841_v26 = vmax.f32 %v759_v1, 0.0  ;;  %v963_v1 = vld [vmem:[%s325_s21] sm:$0xff] }
 0x184   : > { %v1532_v24 = vpop.f32.mrf.mxu0  ;;  %v842_v27 = vmax.f32 %v808_v23, 0.0  ;;  %v819_v23 = vmax.f32 %v1524_v17, 0.0  ;;  %967 = vperm.xlu1 %1321, %v963_v1  }
 0x185   : > { %v1534_v25 = vpop.f32.mrf.mxu1  ;;  %v823_v11 = vmax.f32 %v1532_v24, 0.0  ;;  %v820_v24 = vmax.f32 %v1526_v18, 0.0  ;;  %v1244_v18 = vld [vmem:[%s1585_s3] sm:$0xf] }
 0x186   : > { %v824_v15 = vmax.f32 %v1534_v25, 0.0  ;;  %v817_v25 = vmax.f32 %v1520_v13, 0.0 }
 0x187   : > { %v848_v17 = vpack.c.bf16 %v820_v24, %v818_v21 }
 0x188   : > { %v847_v22 = vpack.c.bf16 %v819_v23, %v817_v25 }
 0x18a   : > { %v761_v28 = vpop.f32.mrf.mxu2 }
 0x18b   : > { %v843_v29 = vmax.f32 %v761_v28, 0.0  ;;  %v810_v30 = vpop.f32.mrf.mxu3  ;;  %v964_v28 = vld [vmem:[%s325_s21 + $0x8] sm:$0x1] }
 0x18c   : > { %v844_v31 = vmax.f32 %v810_v30, 0.0  ;;  %v739_v32 = vpop.f32.mrf.mxu0  ;;  %991 = vperm.xlu2 %1322, %v964_v28   ;;  %v898_v30 = vunpack.c.h.bf16 %v1441_v10 }
 0x18d   : > { %v788_v35 = vpop.f32.mrf.mxu1  ;;  %v859_v36 = vpack.c.bf16 %v843_v29, %v841_v26  ;;  %v825_v6 = vmax.f32 %v739_v32, 0.0  ;;  %v849_v26 = vpack.c.bf16 %v823_v11, %v821_v2  ;;  %v1268_v29 = vld [vmem:[%s1585_s3] sm:$0x10] }
 0x18e   : > { %v860_v39 = vpack.c.bf16 %v844_v31, %v842_v27  ;;  %v826_v7 = vmax.f32 %v788_v35, 0.0  ;;  %v850_v27 = vpack.c.bf16 %v824_v15, %v822_v20  ;;  %v1245_v13 = vor.u32 %v1268_v29, %v1244_v18  ;;  %v925_v35 = vpop.permute.xlu2 %924 }
 0x18f   : > { %869 = vmatpush.bf16.msrb.mxu2 %v859_v36  ;;  %v917_v31 = vperm.slane %v897_v14, 1  ;;  %v918_v32 = vperm.slane %v898_v30, 1  ;;  %v908_v34 = vperm.slane %v898_v30, 0  ;;  %v905_v36 = vpop.permute.xlu0 %904  ;;  %v928_v38 = vperm.slane %v898_v30, 2 }
 0x190   : > { %883 = vmatpush.bf16.msrb.mxu3 %v860_v39  ;;  %v948_v53 = vperm.slane %v898_v30, 4  ;;  %v958_v0 = vperm.slane %v898_v30, 5 }
 0x191   : > { %v919_v39 = vmul.f32 %v917_v31, %v915_v19  ;;  %v920_v40 = vmul.f32 %v918_v32, %v915_v19  ;;  %v910_v41 = vmul.f32 %v908_v34, %v905_v36  ;;  %v930_v43 = vmul.f32 %v928_v38, %v925_v35 }
 0x193   : > { %870 = vmatpush.bf16.msrb.mxu2 %v857_v42  ;;  %v929_v42 = vmul.f32 %v927_v37, %v925_v35 }
 0x194   : > { %884 = vmatpush.bf16.msrb.mxu3 %v858_v45  ;;  %v741_v46 = vpop.f32.mrf.mxu0  ;;  %v922_v45 = vadd.f32 %v920_v40, %v910_v41 }
 0x195   : > { %v790_v47 = vpop.f32.mrf.mxu1  ;;  %v827_v62 = vmax.f32 %v741_v46, 0.0  ;;  %v937_v46 = vperm.slane %v897_v14, 3 }
 0x196   : > { %v828_v3 = vmax.f32 %v790_v47, 0.0  ;;  %v938_v47 = vperm.slane %v898_v30, 3 }
 0x197   : > { %871 = vmatpush.bf16.msrb.mxu2 %v855_v48  ;;  %v851_v12 = vpack.c.bf16 %v827_v62, %v825_v6 }
 0x198   : > { %885 = vmatpush.bf16.msrb.mxu3 %v856_v49  ;;  %v852_v16 = vpack.c.bf16 %v828_v3, %v826_v7  ;;  %v932_v49 = vadd.f32 %v930_v43, %v922_v45 }
 0x19c   : > { %v744_v50 = vpop.f32.mrf.mxu0 }
 0x19d   : > { %v793_v51 = vpop.f32.mrf.mxu1  ;;  %v829_v56 = vmax.f32 %v744_v50, 0.0 }
 0x19e   : > { %v830_v59 = vmax.f32 %v793_v51, 0.0 }
 0x1a4   : > { %v746_v55 = vpop.f32.mrf.mxu0 }
 0x1a5   : > { %v831_v57 = vmax.f32 %v746_v55, 0.0  ;;  %v795_v58 = vpop.f32.mrf.mxu1 }
 0x1a6   : > { %v832_v60 = vmax.f32 %v795_v58, 0.0 }
 0x1a7   : > { %v853_v63 = vpack.c.bf16 %v831_v57, %v829_v56 }
 0x1a8   : > { %v854_v4 = vpack.c.bf16 %v832_v60, %v830_v59 }
 0x1a9   : > { %872 = vmatpush.bf16.msrb.mxu2 %v853_v63 }
 0x1aa   : > { %886 = vmatpush.bf16.msrb.mxu3 %v854_v4 }
 0x1ad   : > { %873 = vmatpush.bf16.msrb.mxu2 %v851_v12 }
 0x1ae   : > { %887 = vmatpush.bf16.msrb.mxu3 %v852_v16 }
 0x1b1   : > { %874 = vmatpush.bf16.msrb.mxu2 %v849_v26 }
 0x1b2   : > { %888 = vmatpush.bf16.msrb.mxu3 %v850_v27 }
 0x1b5   : > { %875 = vmatpush.bf16.msrb.mxu2 %v847_v22 }
 0x1b6   : > { %889 = vmatpush.bf16.msrb.mxu3 %v848_v17 }
 0x1b9   : > { %876 = vmatpush.bf16.msrb.mxu2 %v1516_v8  ;;  %v909_v8 = vmul.f32 %v907_v33, %v905_v36 }
 0x1ba   : > { %890 = vmatpush.bf16.msrb.mxu3 %v1518_v9 }
 0x1bb   : > { %v921_v44 = vadd.f32 %v919_v39, %v909_v8 }
 0x1bc   : > { %877 = vmatmul.bf16.vlgmr.msrb.gmra.mxu2 %v1245_v13 }
 0x1bd   : > { %891 = vmatmul.bf16.vlgmr.msrb.gmra.mxu3 %v1245_v13  ;;  %v931_v48 = vadd.f32 %v929_v42, %v921_v44 }
 0x1c2   : > { %v945_v10 = vpop.permute.xlu2 %944 }
 0x1c3   : > { %v949_v62 = vmul.f32 %v947_v52, %v945_v10  ;;  %v950_v63 = vmul.f32 %v948_v53, %v945_v10 }
 0x1d2   : > { %v955_v4 = vpop.permute.xlu0 %954 }
 0x1d3   : > { %v959_v12 = vmul.f32 %v957_v61, %v955_v4  ;;  %v960_v15 = vmul.f32 %v958_v0, %v955_v4 }
 0x1d9   : > { %v935_v9 = vpop.permute.xlu1 %934 }
 0x1da   : > { %v939_v50 = vmul.f32 %v937_v46, %v935_v9  ;;  %v940_v51 = vmul.f32 %v938_v47, %v935_v9 }
 0x1dc   : > { %v941_v59 = vadd.f32 %v939_v50, %v931_v48  ;;  %v942_v60 = vadd.f32 %v940_v51, %v932_v49 }
 0x1de   : > { %v951_v7 = vadd.f32 %v949_v62, %v941_v59  ;;  %v952_v11 = vadd.f32 %v950_v63, %v942_v60 }
 0x1e0   : > { %v961_v28 = vadd.f32 %v959_v12, %v951_v7  ;;  %v962_v25 = vadd.f32 %v960_v15, %v952_v11 }
 0x1e6   : > { %v992_v6 = vpop.permute.xlu2 %991 }
 0x1e7   : > { %v994_v2 = vrot.slane %v992_v6, 6 }
 0x1f6   : > { %v968_v57 = vpop.permute.xlu1 %967 }
 0x1f7   : > { %v993_v16 = vrot.slane %v968_v57, 6 }
 0x1f9   : > { %v995_v17 = vsel %vm978_vm2, %v993_v16, %v994_v2 }
 0x23f   : > { %v878_v54 = vpop.f32.mrf.mxu2 }
 0x240   : > { %v892_v55 = vpop.f32.mrf.mxu3  ;;  %v899_v56 = vadd.f32 %v897_v14, %v878_v54  ;;  %v979_v1 = vrot.slane %v878_v54, 6 }
 0x241   : > { %v900_v58 = vadd.f32 %v898_v30, %v892_v55  ;;  %v982_v24 = vrot.slane %v892_v55, 6 }
 0x242   : > { %v970_v3 = vadd.f32 %v968_v57, %v899_v56 }
 0x243   : > { %v971_v5 = vadd.f32 %v968_v57, %v900_v58 }
 0x244   : > { %972 = vst [vmem:[%s334_s10] sm:$0x3f] %v970_v3 }
 0x245   : > { %973 = vst [vmem:[%s334_s10 + $0x8] sm:$0x3f] %v971_v5 }
 0x247   : > { %v880_v20 = vpop.f32.mrf.mxu2 }
 0x248   : > { %v894_v23 = vpop.f32.mrf.mxu3  ;;  %v980_v26 = vrot.slane %v880_v20, 6 }
 0x249   : > { %v983_v27 = vrot.slane %v894_v23, 6 }
 0x24a   : > { %v981_v21 = vsel %vm978_vm2, %v979_v1, %v980_v26 }
 0x24b   : > { %v984_v22 = vsel %vm978_vm2, %v982_v24, %v983_v27  ;;  %v987_v29 = vadd.f32 %v981_v21, %v961_v28 }
 0x24c   : > { %v988_v18 = vadd.f32 %v984_v22, %v962_v25 }
 0x24d   : > { %v997_v14 = vadd.f32 %v995_v17, %v987_v29 }
 0x24e   : > { %v998_v13 = vadd.f32 %v995_v17, %v988_v18 }
 0x250   : > { %v1001_v19 = vrot.slane %v998_v13, 4 }
 0x252   : > { %v1003_v30 = vsel %vm422_vm0, %v997_v14, %v1001_v19 }
 0x253   : > { %1005 = vst [vmem:[%s344_s13] sm:$0x77] %v1003_v30 }
 0x254 PF: > { %s18_s26 = sadd.s32 1, %s1346_s26   ;;  %s1590_s24 = smov %s1342_s25 }
 0x255   : > { %p15_p5 = scmp.ge.s32.totalorder %s18_s26, 4   ;;  %s1591_s25 = smov %s1593_s27 }
 0x257   :  { %17 = sbr.rel (!%p15_p5) target bundleno = 2 (0x2), region = 89 }

</bundles_post_ra>
